<compile_context>
chip_gen: v7x
topology: tpu7x:2x2x1
jax: 0.10.0
libtpu: 0.0.40
codegen_flags: <defaults>
</compile_context>

<pallas_src>
import functools

import jax
import jax.numpy as jnp
from jax.experimental import pallas as pl
from jax.experimental.pallas import tpu as pltpu

_LANE = 128
_BIG_E2 = 1e30  # ||e||^2 assigned to padded (dummy) codes -> never selected by argmin


def _round_up(x, m):
    return ((x + m - 1) // m) * m


def _vmem_budget_bytes():
    """Physical VMEM with ~22% headroom (compiler scratch, semaphores, spills)."""
    phys = None
    try:
        info = pltpu.get_tpu_info()
        phys = getattr(info, "vmem_capacity_bytes", None)
    except Exception:
        phys = None
    if not phys:
        phys = 64 * 2**20  # conservative fallback: v7x per-TensorCore VMEM
    return int(phys * 0.78)  # ~50 MiB on v7x (64 MiB), ~100 MiB on v5e/v6e (128 MiB)


def _nearest_code(x, e, e2, bf16_dist):
    """Shared assignment math: nearest codebook column + per-row SSE.

    x : (TILE_N, Dp) f32   e : (Dp, Kp) f32   e2 : (1, Kp) f32  (precomputed ||e_k||^2)
    """
    if bf16_dist:
        # Dominant matmul in native bf16 (single MXU pass); combine stays f32.
        xe = jnp.dot(x.astype(jnp.bfloat16), e.astype(jnp.bfloat16),
                     preferred_element_type=jnp.float32)
    else:
        xe = jnp.dot(x, e, preferred_element_type=jnp.float32)

    # argmin_k ||x - e_k||^2 == argmin_k (||e_k||^2 - 2 x.e_k): per-row ||x||^2 dropped.
    score = e2 - 2.0 * xe                                    # (TILE_N, Kp)
    ind = jnp.argmin(score, axis=1).astype(jnp.int32)        # (TILE_N,)

    # ||x - e_ind||^2 = ||x||^2 + min_k score; clamp (expansion can dip slightly < 0).
    x2 = jnp.sum(x * x, axis=-1)                             # (TILE_N,)
    sse = jnp.maximum(x2 + jnp.min(score, axis=1), 0.0)      # (TILE_N,)
    return ind, sse, score


def _quantize_kernel_fused(x_ref, embed_ref, e2_ref, q_ref, sse_ref, ind_ref, *,
                           bf16_dist):
    """Small-K path: in-kernel one-hot codebook gather on the MXU."""
    x = x_ref[...]            # (TILE_N, Dp) f32, pipelined row tile
    e = embed_ref[...]        # (Dp, Kp)     f32, VMEM-resident across the grid
    e2 = e2_ref[...]          # (1, Kp)      f32, VMEM-resident

    ind, sse, score = _nearest_code(x, e, e2, bf16_dist)

    # Codebook gather: onehot (TILE_N, Kp) contracted against the K axis of embed.
    lane_ids = jax.lax.broadcasted_iota(jnp.int32, score.shape, 1)
    onehot = (lane_ids == ind[:, None]).astype(jnp.float32)
    q = jax.lax.dot_general(
        onehot, e,
        dimension_numbers=(((1,), (1,)), ((), ())),
        preferred_element_type=jnp.float32,
    )                                                         # (TILE_N, Dp)

    q_ref[...] = q
    sse_ref[...] = sse[None, :]                               # (1, TILE_N) lane-dense
    ind_ref[...] = ind[None, :]


def _quantize_kernel_assign(x_ref, embed_ref, e2_ref, sse_ref, ind_ref, *, bf16_dist):
    """Large-K path: indices + SSE only; the row gather happens wrapper-side."""
    ind, sse, _ = _nearest_code(x_ref[...], embed_ref[...], e2_ref[...], bf16_dist)
    sse_ref[...] = sse[None, :]
    ind_ref[...] = ind[None, :]


def quantize_forward(input_, embed, mean=False, *, bf16_dist=True, tile_n=None,
                     gather_in_kernel=None):
    """Pallas equivalent of Quantize.forward (eval mode).

    input_: (..., D) float array (or (B, D, T) with mean=True, reduced over dim=2)
    embed:  (D, K) codebook
    returns (quantize, diff, embed_ind) matching the PyTorch module's forward values.
    """
    if mean:
        input_ = jnp.mean(input_, axis=2)
    D, K = embed.shape
    flatten = input_.reshape(-1, D).astype(jnp.float32)
    N = flatten.shape[0]
    embed_f32 = embed.astype(jnp.float32)

    # ||e_k||^2 hoisted out of the kernel (computed once, on the unpadded codebook).
    e2 = jnp.sum(embed_f32 * embed_f32, axis=0, keepdims=True)           # (1, K)

    # Pad D / K up to lane-native multiples of 128: zero columns/rows are exact no-ops
    # for the distances; padded codes get a huge ||e||^2 so they never win the argmin.
    D_pad = max(_round_up(D, _LANE), _LANE)
    K_pad = max(_round_up(K, _LANE), _LANE)
    if D_pad != D:
        flatten_p = jnp.pad(flatten, ((0, 0), (0, D_pad - D)))
        embed_p = jnp.pad(embed_f32, ((0, D_pad - D), (0, 0)))
    else:
        flatten_p, embed_p = flatten, embed_f32
    if K_pad != K:
        embed_p = jnp.pad(embed_p, ((0, 0), (0, K_pad - K)))
        e2_p = jnp.pad(e2, ((0, 0), (0, K_pad - K)), constant_values=_BIG_E2)
    else:
        e2_p = e2

    # The in-kernel one-hot gather doubles the MXU FLOPs just to select rows; only do
    # it when the codebook is small. For big K gather outside with XLA (embed.T[ind]).
    if gather_in_kernel is None:
        gather_in_kernel = K_pad <= 512
    fused = bool(gather_in_kernel)

    # ---- VMEM-budget-aware tile selection -------------------------------------------
    itemsize = 4
    vmem_budget = _vmem_budget_bytes()
    resident = 2 * (D_pad * K_pad + K_pad) * itemsize        # codebook + e2 (2x buffers)
    # Per-row VMEM: pipelined x (+ q) tiles are double-buffered; the (TILE_N, Kp)
    # score (+ onehot) temporaries are single instances; sse/ind rows are tiny.
    per_row = itemsize * (2 * D_pad
                          + (2 * D_pad if fused else 0)
                          + K_pad * (2 if fused else 1)
                          + 16)
    if tile_n is None:
        avail = max(vmem_budget - resident - (4 << 20), 1 << 20)
        max_tile = max(int(avail // per_row), _LANE)
        target = max(min((max_tile // _LANE) * _LANE, 2048), _LANE)
        # >= 2 grid steps once N is large enough so the "parallel" grid axis can be
        # split across both TensorCores of a v7x chip (no-op on single-TC v5e/v6e).
        min_tiles = 2 if N >= 2 * _LANE else 1
        num_tiles = max(pl.cdiv(N, target), min_tiles)
        tile_n = _round_up(pl.cdiv(N, num_tiles), _LANE)     # divisor-friendly tile
    tile_n = max(_round_up(int(tile_n), _LANE), _LANE)

    G = pl.cdiv(N, tile_n)
    Np = G * tile_n
    if Np != N:
        flatten_p = jnp.pad(flatten_p, ((0, Np - N), (0, 0)))

    vmem_needed = resident + tile_n * per_row + (2 << 20)
    vmem_limit = int(min(max(2 * vmem_needed, 32 * 2**20), vmem_budget))

    dist_flops = 2 * Np * K_pad * D_pad
    cost = pl.CostEstimate(
        flops=int(dist_flops * (2 if fused else 1)),
        transcendentals=0,
        bytes_accessed=int(itemsize * (Np * D_pad * (2 if fused else 1)
                                       + D_pad * K_pad + K_pad + 2 * Np)),
    )

    in_specs = [
        pl.BlockSpec((tile_n, D_pad), lambda i: (i, 0)),     # x row tile (pipelined)
        pl.BlockSpec((D_pad, K_pad), lambda i: (0, 0)),      # codebook, VMEM-resident
        pl.BlockSpec((1, K_pad), lambda i: (0, 0)),          # ||e||^2 row, resident
    ]
    compiler_params = pltpu.CompilerParams(
        dimension_semantics=("parallel",),
        vmem_limit_bytes=vmem_limit,
    )

    if fused:
        kernel = functools.partial(_quantize_kernel_fused, bf16_dist=bf16_dist)
        q, sse, ind = pl.pallas_call(
            kernel,
            grid=(G,),
            out_shape=(
                jax.ShapeDtypeStruct((Np, D_pad), jnp.float32),
                jax.ShapeDtypeStruct((G, tile_n), jnp.float32),
                jax.ShapeDtypeStruct((G, tile_n), jnp.int32),
            ),
            in_specs=in_specs,
            out_specs=(
                pl.BlockSpec((tile_n, D_pad), lambda i: (i, 0)),  # quantize row tile
                pl.BlockSpec((1, tile_n), lambda i: (i, 0)),      # per-row SSE
                pl.BlockSpec((1, tile_n), lambda i: (i, 0)),      # indices
            ),
            compiler_params=compiler_params,
            cost_estimate=cost,
        )(flatten_p, embed_p, e2_p)
        quantize = q[:N, :D]
    else:
        kernel = functools.partial(_quantize_kernel_assign, bf16_dist=bf16_dist)
        sse, ind = pl.pallas_call(
            kernel,
            grid=(G,),
            out_shape=(
                jax.ShapeDtypeStruct((G, tile_n), jnp.float32),
                jax.ShapeDtypeStruct((G, tile_n), jnp.int32),
            ),
            in_specs=in_specs,
            out_specs=(
                pl.BlockSpec((1, tile_n), lambda i: (i, 0)),
                pl.BlockSpec((1, tile_n), lambda i: (i, 0)),
            ),
            compiler_params=compiler_params,
            cost_estimate=cost,
        )(flatten_p, embed_p, e2_p)
        quantize = None

    embed_ind = ind.reshape(-1)[:N]
    if quantize is None:
        quantize = jnp.take(embed_f32.T, embed_ind, axis=0)   # wrapper-side gather
    diff = jnp.sum(sse.reshape(-1)[:N]) / (N * D)
    quantize = quantize.reshape(input_.shape)
    # Forward value of the straight-through estimator x + stop_grad(q - x) is just q.
    return quantize, diff, embed_ind


def _reference(input_, embed, mean=False):
    if mean:
        input_ = jnp.mean(input_, axis=2)
    D = embed.shape[0]
    flatten = input_.reshape(-1, D)
    dist = (
        jnp.sum(flatten**2, axis=-1, keepdims=True)
        - 2.0 * flatten @ embed
        + jnp.sum(embed**2, axis=0, keepdims=True)
    )
    ind = jnp.argmin(dist, axis=1).astype(jnp.int32)
    q = embed.T[ind]
    diff = jnp.mean((q - flatten) ** 2)
    quantize = flatten + jax.lax.stop_gradient(q - flatten)
    return quantize.reshape(input_.shape), diff, ind, dist


if __name__ == "__main__":
    key = jax.random.PRNGKey(0)
    k_x, k_e, k_m = jax.random.split(key, 3)

    # small shapes: batch=2, seq=8 -> N=16 flattened rows, embed_dim=32, n_embed=128
    B, T, D, K = 2, 8, 32, 128
    x = jax.random.normal(k_x, (B, T, D), dtype=jnp.float32)
    embed = jax.random.normal(k_e, (D, K), dtype=jnp.float32)  # torch.randn(dim, n_embed)

    q_ref, d_ref, i_ref, dist_ref = _reference(x, embed)
    flat = x.reshape(-1, D)

    # 1) exact-semantics path: f32 distances, in-kernel one-hot gather
    q0, d0, i0 = quantize_forward(x, embed, bf16_dist=False)
    jax.block_until_ready((q0, d0, i0))
    assert q0.shape == (B, T, D)
    assert i0.shape == (B * T,)
    assert jnp.array_equal(i0, i_ref)
    assert jnp.allclose(q0, q_ref, atol=1e-4, rtol=1e-4)
    assert jnp.allclose(d0, d_ref, atol=1e-4, rtol=1e-4)

    # 2) default fast path (bf16 distance matmul): chosen code must be (near-)nearest
    q1, d1, i1 = quantize_forward(x, embed)  # bf16_dist=True by default
    jax.block_until_ready((q1, d1, i1))
    assert q1.shape == (B, T, D)
    chosen_dist = dist_ref[jnp.arange(flat.shape[0]), i1]
    assert jnp.all(chosen_dist <= dist_ref.min(axis=1) + 0.5)
    assert jnp.allclose(q1.reshape(-1, D), embed.T[i1], atol=1e-4, rtol=1e-4)
    assert jnp.allclose(d1, jnp.mean((embed.T[i1] - flat) ** 2), atol=5e-2, rtol=5e-2)

    # 3) wrapper-side gather code path (forced on, exact distances)
    q2, d2, i2 = quantize_forward(x, embed, bf16_dist=False, gather_in_kernel=False)
    jax.block_until_ready((q2, d2, i2))
    assert jnp.array_equal(i2, i_ref)
    assert jnp.allclose(q2, q_ref, atol=1e-4, rtol=1e-4)
    assert jnp.allclose(d2, d_ref, atol=1e-4, rtol=1e-4)

    # 4) mean=True branch: input (B, D, T) reduced over dim=2 -> (B, D)
    xm = jax.random.normal(k_m, (B, D, T), dtype=jnp.float32)
    qm, dm, im = quantize_forward(xm, embed, mean=True, bf16_dist=False)
    jax.block_until_ready((qm, dm, im))
    qm_ref, dm_ref, im_ref, _ = _reference(xm, embed, mean=True)
    assert qm.shape == (B, D)
    assert im.shape == (B,)
    assert jnp.array_equal(im, im_ref)
    assert jnp.allclose(qm, qm_ref, atol=1e-4, rtol=1e-4)
    assert jnp.allclose(dm, dm_ref, atol=1e-4, rtol=1e-4)

    print("KERNEL_OK")
</pallas_src>

<mosaic_0001>
module attributes {stable_mosaic.version = 11 : i64} {
  func.func @_quantize_kernel_fused(%arg0: i32, %arg1: memref<128x128xf32, #tpu.memory_space<vmem>>, %arg2: memref<128x128xf32, #tpu.memory_space<vmem>>, %arg3: memref<1x128xf32, #tpu.memory_space<vmem>>, %arg4: memref<128x128xf32, #tpu.memory_space<vmem>>, %arg5: memref<1x128xf32, #tpu.memory_space<vmem>>, %arg6: memref<1x128xi32, #tpu.memory_space<vmem>>) attributes {dimension_semantics = [#tpu.dimension_semantics<parallel>], iteration_bounds = array<i64: 1>, scalar_prefetch = 0 : i64, scratch_operands = 0 : i64, tpu.core_type = #tpu.core_type<tc>, window_params = [{transform_indices = @transform_0, window_bounds = array<i64: 128, 128>}, {pipeline_mode = #tpu.pipeline_mode<synchronous>, transform_indices = @transform_1, window_bounds = array<i64: 128, 128>}, {pipeline_mode = #tpu.pipeline_mode<synchronous>, transform_indices = @transform_2, window_bounds = array<i64: 1, 128>}, {transform_indices = @transform_3, window_bounds = array<i64: 128, 128>}, {transform_indices = @transform_4, window_bounds = array<i64: 1, 128>}, {transform_indices = @transform_5, window_bounds = array<i64: 1, 128>}]} {
    %c0 = arith.constant 0 : index
    %c0_0 = arith.constant 0 : index
    %0 = vector.load %arg1[%c0, %c0_0] : memref<128x128xf32, #tpu.memory_space<vmem>>, vector<128x128xf32>
    %c0_1 = arith.constant 0 : index
    %c0_2 = arith.constant 0 : index
    %1 = vector.load %arg2[%c0_1, %c0_2] : memref<128x128xf32, #tpu.memory_space<vmem>>, vector<128x128xf32>
    %c0_3 = arith.constant 0 : index
    %c0_4 = arith.constant 0 : index
    %2 = vector.load %arg3[%c0_3, %c0_4] : memref<1x128xf32, #tpu.memory_space<vmem>>, vector<1x128xf32>
    %cst = arith.constant dense<0.000000e+00> : vector<128x128xf32>
    %3 = tpu.matmul %0, %1, %cst {dimension_numbers = #tpu.dot_dimension_numbers<[1], [0], [0], [1], [0, 0, 1, 1], [], []>} : vector<128x128xf32>, vector<128x128xf32>, vector<128x128xf32> -> vector<128x128xf32>
    %cst_5 = arith.constant 2.000000e+00 : f32
    %4 = vector.broadcast %cst_5 : f32 to vector<128x128xf32>
    %5 = arith.mulf %4, %3 : vector<128x128xf32>
    %6 = vector.broadcast %2 : vector<1x128xf32> to vector<128x128xf32>
    %7 = arith.subf %6, %5 : vector<128x128xf32>
    %8 = tpu.reduce_index %7 {axis = 1 : i32, kind = #tpu.reduction_kind<arg_min>} : vector<128x128xf32> -> vector<128xi32>
    %9 = arith.mulf %0, %0 : vector<128x128xf32>
    %cst_6 = arith.constant dense<0.000000e+00> : vector<128xf32>
    %10 = vector.multi_reduction <add>, %9, %cst_6 [1] : vector<128x128xf32> to vector<128xf32>
    %cst_7 = arith.constant dense<0x7F800000> : vector<128xf32>
    %11 = vector.multi_reduction <minimumf>, %7, %cst_7 [1] : vector<128x128xf32> to vector<128xf32>
    %12 = arith.addf %10, %11 : vector<128xf32>
    %cst_8 = arith.constant 0.000000e+00 : f32
    %13 = vector.broadcast %cst_8 : f32 to vector<128xf32>
    %14 = arith.maximumf %12, %13 : vector<128xf32>
    %15 = tpu.iota {dimensions = array<i32: 1>} : vector<128x128xi32>
    %16 = vector.shape_cast %8 : vector<128xi32> to vector<128x1xi32>
    %17 = vector.broadcast %16 : vector<128x1xi32> to vector<128x128xi32>
    %18 = arith.cmpi eq, %15, %17 : vector<128x128xi32>
    %19 = arith.extui %18 : vector<128x128xi1> to vector<128x128xi32>
    %20 = arith.sitofp %19 : vector<128x128xi32> to vector<128x128xf32>
    %cst_9 = arith.constant dense<0.000000e+00> : vector<128x128xf32>
    %21 = tpu.matmul %20, %1, %cst_9 {dimension_numbers = #tpu.dot_dimension_numbers<[1], [1], [0], [0], [0, 0, 1, 0], [], []>} : vector<128x128xf32>, vector<128x128xf32>, vector<128x128xf32> -> vector<128x128xf32>
    %c0_10 = arith.constant 0 : index
    %c0_11 = arith.constant 0 : index
    %22 = vector.load %arg4[%c0_10, %c0_11] : memref<128x128xf32, #tpu.memory_space<vmem>>, vector<128x128xf32>
    tpu.vector_store %arg4[%c0_10, %c0_11], %21 {strides = array<i32>} : memref<128x128xf32, #tpu.memory_space<vmem>>, vector<128x128xf32>,
    %23 = vector.shape_cast %14 : vector<128xf32> to vector<1x128xf32>
    %c0_12 = arith.constant 0 : index
    %c0_13 = arith.constant 0 : index
    %24 = vector.load %arg5[%c0_12, %c0_13] : memref<1x128xf32, #tpu.memory_space<vmem>>, vector<1x128xf32>
    tpu.vector_store %arg5[%c0_12, %c0_13], %23 {strides = array<i32>} : memref<1x128xf32, #tpu.memory_space<vmem>>, vector<1x128xf32>,
    %25 = vector.shape_cast %8 : vector<128xi32> to vector<1x128xi32>
    %c0_14 = arith.constant 0 : index
    %c0_15 = arith.constant 0 : index
    %26 = vector.load %arg6[%c0_14, %c0_15] : memref<1x128xi32, #tpu.memory_space<vmem>>, vector<1x128xi32>
    tpu.vector_store %arg6[%c0_14, %c0_15], %25 {strides = array<i32>} : memref<1x128xi32, #tpu.memory_space<vmem>>, vector<1x128xi32>,
    return
  }
  func.func @transform_0(%arg0: i32) -> (i32, i32) {
    %c0_i32 = arith.constant 0 : i32
    %c0_i32_0 = arith.constant 0 : i32
    return %arg0, %c0_i32 : i32, i32
  }
  func.func @transform_1(%arg0: i32) -> (i32, i32) {
    %c0_i32 = arith.constant 0 : i32
    %c0_i32_0 = arith.constant 0 : i32
    %c0_i32_1 = arith.constant 0 : i32
    return %c0_i32, %c0_i32_0 : i32, i32
  }
  func.func @transform_2(%arg0: i32) -> (i32, i32) {
    %c0_i32 = arith.constant 0 : i32
    %c0_i32_0 = arith.constant 0 : i32
    %c0_i32_1 = arith.constant 0 : i32
    return %c0_i32, %c0_i32_0 : i32, i32
  }
  func.func @transform_3(%arg0: i32) -> (i32, i32) {
    %c0_i32 = arith.constant 0 : i32
    %c0_i32_0 = arith.constant 0 : i32
    return %arg0, %c0_i32 : i32, i32
  }
  func.func @transform_4(%arg0: i32) -> (i32, i32) {
    %c0_i32 = arith.constant 0 : i32
    %c0_i32_0 = arith.constant 0 : i32
    return %arg0, %c0_i32 : i32, i32
  }
  func.func @transform_5(%arg0: i32) -> (i32, i32) {
    %c0_i32 = arith.constant 0 : i32
    %c0_i32_0 = arith.constant 0 : i32
    return %arg0, %c0_i32 : i32, i32
  }
}

</mosaic_0001>

<bundles_post_ra>
// kernel: tpu_custom_call.1
= control target key start
LH: loop header
LB: loop body
LE: loop exit
PB: predicated region body
PF: predicated region fallthrough
CT: control target
= control target key end

     0   :  { %11 = vsyncpa [#allocation3], 0  ;;  %s1621_s0 = inlined_call_operand.hbm [shape: f32[128,128], index: 0, kind: input, shape index: {}]   ;;  %s1622_s1 = inlined_call_operand.hbm [shape: f32[128,128], index: 1, kind: input, shape index: {}]   ;;  %s1623_s2 = inlined_call_operand.vmem [shape: f32[1,128], index: 2, kind: input, shape index: {}]   ;;  %s1624_s3 = inlined_call_operand.hbm [shape: f32[128,128], index: 3, kind: output, shape index: {0}]   ;;  %s1625_s4 = inlined_call_operand.hbm [shape: f32[1,128], index: 4, kind: output, shape index: {1}]   ;;  %s1626_s5 = inlined_call_operand.hbm [shape: s32[1,128], index: 5, kind: output, shape index: {2}]  }
   0x1   :  { %12 = vsyncpa [#allocation6], 0 }
   0x2   :  { %13 = vsyncpa [#allocation4], 0 }
   0x3   :  { %14 = vsyncpa [#allocation9], 0  ;;  %s1269_s18 = smov [#allocation2]   ;;  %s1151_s22 = scalar_lea.hbm %s1621_s0, 2048 }
   0x4   :  { %s20_s19 = sshll.u32 %s1269_s18, 4  ;;  %p1152_p0 = scmp.ne.s32.totalorder %s1621_s0, %s1151_s22  ;;  %s21_s19 = int_to_ptr.vmem [resolvable:$true] %s20_s19 }
   0x5   :  { %p1155_p1 = scmp.lt.u32.totalorder %s1151_s22, %s1621_s0 }
   0x7   :  { %p1157_p2 = pnand %p1155_p1, %p1152_p0 }
   0x9   :  { %1160 = shalt.err (!%p1157_p2)
}
   0xa   :  { %s1161_s27 = scalar_lea.vmem %s21_s19, 2048  ;;  %p1166_p4 = scmp.lt.s32.totalorder %s21_s19, %s21_s19 }
   0xb   :  { %p1162_p3 = scmp.ne.s32.totalorder %s21_s19, %s1161_s27  ;;  %p1167_p5 = scmp.lt.s32.totalorder %s1161_s27, %s1161_s27 }
   0xd   :  { %p1168_p6 = por %p1167_p5, %p1166_p4 }
   0xf   :  { %p1169_p7 = pnand %p1168_p6, %p1162_p3 }
  0x11   :  { %1172 = shalt.err (!%p1169_p7)
}
  0x12   :  { %s1270_s28 = smov 128   ;;  %s1271_s29 = smov 8  }
  0x13   :  { %26 = dma.hbm_to_vmem [thread:$0]  %s1621_s0, 2048, %s21_s19, [#allocation3], %s1270_s28, %s1270_s28, %s1271_s29  }
  0x14   :  { %s1272_s7 = smov [#allocation5]   ;;  %s1173_s11 = scalar_lea.hbm %s1622_s1, 2048 }
  0x15   :  { %s32_s8 = sshll.u32 %s1272_s7, 4  ;;  %p1174_p8 = scmp.ne.s32.totalorder %s1622_s1, %s1173_s11  ;;  %s33_s8 = int_to_ptr.vmem [resolvable:$true] %s32_s8 }
  0x16   :  { %p1177_p9 = scmp.lt.u32.totalorder %s1173_s11, %s1622_s1 }
  0x18   :  { %p1179_p10 = pnand %p1177_p9, %p1174_p8 }
  0x1a   :  { %1182 = shalt.err (!%p1179_p10)
}
  0x1b   :  { %s1183_s16 = scalar_lea.vmem %s33_s8, 2048  ;;  %p1188_p12 = scmp.lt.s32.totalorder %s33_s8, %s33_s8 }
  0x1c   :  { %p1184_p11 = scmp.ne.s32.totalorder %s33_s8, %s1183_s16  ;;  %p1189_p13 = scmp.lt.s32.totalorder %s1183_s16, %s1183_s16 }
  0x1e   :  { %p1190_p0 = por %p1189_p13, %p1188_p12 }
  0x20   :  { %p1191_p1 = pnand %p1190_p0, %p1184_p11 }
  0x22   :  { %1194 = shalt.err (!%p1191_p1)
}
  0x23   :  { %38 = dma.hbm_to_vmem [thread:$0]  %s1622_s1, 2048, %s33_s8, [#allocation6], %s1270_s28, %s1270_s28, %s1271_s29  }
  0x24   :  { %1261 = dma.done.wait [#allocation3], 2048  }
  0x25   :  { %1262 = vsyncadd [#allocation3], 4294965248 }
  0x26   :  { %1263 = dma.done.wait [#allocation6], 2048  }
  0x27   :  { %1264 = vsyncadd [#allocation6], 4294965248  ;;  %v63_v0 = vld [vmem:[#allocation5] sm:$0xff]  ;;  %v64_v1 = vld [vmem:[#allocation5 + $0x8] sm:$0xff]  ;;  %vm643_vm1 = vcmask 130112   ;;  %vm650_vm4 = vcmask 195712  }
  0x28   :  { %v65_v2 = vld [vmem:[#allocation5 + $0x10] sm:$0xff]  ;;  %v1079_v3 = vpack.c.bf16 %v64_v1, %v63_v0  ;;  %v66_v4 = vld [vmem:[#allocation5 + $0x18] sm:$0xff]  ;;  %v67_v6 = vld [vmem:[#allocation5 + $0x20] sm:$0xff]  ;;  %vm657_vm5 = vcmask 261312   ;;  %vm664_vm8 = vcmask 326912   ;;  %vm671_vm9 = vcmask 392512  }
  0x29   :  { %v1083_v5 = vpack.c.bf16 %v66_v4, %v65_v2  ;;  %v68_v7 = vld [vmem:[#allocation5 + $0x28] sm:$0xff]  ;;  %v1337_v9 = vld [vmem:[#allocation2] sm:$0xff]  ;;  %v69_v10 = vld [vmem:[#allocation5 + $0x30] sm:$0xff]  ;;  %vm678_vm12 = vcmask 458112   ;;  %vm685_vm13 = vcmask 523712  }
  0x2a   :  { %1080 = vmatprep.subr.bf16.mxu0 %v1079_v3  ;;  %1112 = vmatprep.subr.bf16.mxu1 %v1079_v3  ;;  %v1087_v8 = vpack.c.bf16 %v68_v7, %v67_v6  ;;  %v70_v11 = vld [vmem:[#allocation5 + $0x38] sm:$0xff]  ;;  %v71_v13 = vld [vmem:[#allocation5 + $0x40] sm:$0xff]  ;;  %v72_v14 = vld [vmem:[#allocation5 + $0x48] sm:$0xff] }
  0x2b   :  { %1082 = vmatpush3.bf16.msra.mxu0 %v1079_v3  ;;  %1114 = vmatpush3.bf16.xpose.msra.mxu1 %v1079_v3  ;;  %v1091_v12 = vpack.c.bf16 %v70_v11, %v69_v10  ;;  %v1095_v15 = vpack.c.bf16 %v72_v14, %v71_v13  ;;  %v73_v16 = vld [vmem:[#allocation5 + $0x50] sm:$0xff]  ;;  %v74_v17 = vld [vmem:[#allocation5 + $0x58] sm:$0xff]  ;;  %v75_v19 = vld [vmem:[#allocation5 + $0x60] sm:$0xff] }
  0x2c   :  { %1084 = vmatprep.subr.bf16.mxu0 %v1083_v5  ;;  %1116 = vmatprep.subr.bf16.mxu1 %v1083_v5  ;;  %v1099_v18 = vpack.c.bf16 %v74_v17, %v73_v16  ;;  %v76_v20 = vld [vmem:[#allocation5 + $0x68] sm:$0xff]  ;;  %v77_v22 = vld [vmem:[#allocation5 + $0x70] sm:$0xff]  ;;  %v78_v23 = vld [vmem:[#allocation5 + $0x78] sm:$0xff] }
  0x2d   :  { %999 = vmatprep.mubr.f32.mxu0 %v1337_v9  ;;  %v1103_v21 = vpack.c.bf16 %v76_v20, %v75_v19  ;;  %v1107_v24 = vpack.c.bf16 %v78_v23, %v77_v22  ;;  %v1340_v25 = vld [vmem:[#allocation2 + $0x8] sm:$0xff]  ;;  %v1342_v26 = vld [vmem:[#allocation2 + $0x10] sm:$0xff]  ;;  %v1346_v27 = vld [vmem:[#allocation2 + $0x18] sm:$0xff] }
  0x2e   :  { %v1348_v28 = vld [vmem:[#allocation2 + $0x20] sm:$0xff]  ;;  %v1352_v29 = vld [vmem:[#allocation2 + $0x28] sm:$0xff]  ;;  %v1354_v30 = vld [vmem:[#allocation2 + $0x30] sm:$0xff] }
  0x2f   :  { %1086 = vmatpush3.bf16.msra.mxu0 %v1083_v5  ;;  %v1358_v31 = vld [vmem:[#allocation2 + $0x38] sm:$0xff]  ;;  %v1360_v32 = vld [vmem:[#allocation2 + $0x40] sm:$0xff]  ;;  %v1364_v33 = vld [vmem:[#allocation2 + $0x48] sm:$0xff] }
  0x30   :  { %1088 = vmatprep.subr.bf16.mxu0 %v1087_v8  ;;  %v1366_v34 = vld [vmem:[#allocation2 + $0x50] sm:$0xff]  ;;  %v1370_v35 = vld [vmem:[#allocation2 + $0x58] sm:$0xff]  ;;  %v1372_v36 = vld [vmem:[#allocation2 + $0x60] sm:$0xff] }
  0x31   :  { %v1376_v37 = vld [vmem:[#allocation2 + $0x68] sm:$0xff]  ;;  %v1378_v38 = vld [vmem:[#allocation2 + $0x70] sm:$0xff]  ;;  %v1382_v39 = vld [vmem:[#allocation2 + $0x78] sm:$0xff] }
  0x32   :  { %v870_v42 = vld [vmem:[%s1623_s2] ss:$0 sm:$0xff]  ;;  %s1274_s2 = smov [#allocation8]  }
  0x33   :  { %1090 = vmatpush3.bf16.msra.mxu0 %v1087_v8  ;;  %1118 = vmatpush3.bf16.xpose.msra.mxu1 %v1083_v5  ;;  %s843_s19 = sshll.u32 %s1274_s2, 4  ;;  %s844_s19 = int_to_ptr.vmem [resolvable:$true] %s843_s19 }
  0x34   :  { %1092 = vmatprep.subr.bf16.mxu0 %v1091_v12  ;;  %1120 = vmatprep.subr.bf16.mxu1 %v1087_v8  ;;  %s1195_s20 = scalar_lea.vmem %s844_s19, 16  ;;  %s1199_s21 = scalar_lea.vmem %s844_s19, 32 }
  0x35   :  { %p1196_p2 = scmp.ne.s32.totalorder %s844_s19, %s1195_s20  ;;  %p1200_p3 = scmp.lt.s32.totalorder %s844_s19, %s844_s19 }
  0x36   :  { %p1201_p4 = scmp.lt.s32.totalorder %s1199_s21, %s1195_s20 }
  0x37   :  { %1094 = vmatpush3.bf16.msra.mxu0 %v1091_v12 }
  0x38   :  { %1096 = vmatprep.subr.bf16.mxu0 %v1095_v15  ;;  %p1202_p5 = por %p1201_p4, %p1200_p3 }
  0x3a   :  { %p1203_p6 = pnand %p1202_p5, %p1196_p2 }
  0x3b   :  { %1098 = vmatpush3.bf16.msra.mxu0 %v1095_v15  ;;  %1122 = vmatpush3.bf16.xpose.msra.mxu1 %v1087_v8 }
  0x3c   :  { %1100 = vmatprep.subr.bf16.mxu0 %v1099_v18  ;;  %1124 = vmatprep.subr.bf16.mxu1 %v1091_v12 }
  0x3f   :  { %1102 = vmatpush3.bf16.msra.mxu0 %v1099_v18 }
  0x40   :  { %1104 = vmatprep.subr.bf16.mxu0 %v1103_v21 }
  0x43   :  { %1106 = vmatpush3.bf16.msra.mxu0 %v1103_v21  ;;  %1126 = vmatpush3.bf16.xpose.msra.mxu1 %v1091_v12 }
  0x44   :  { %1108 = vmatprep.subr.bf16.mxu0 %v1107_v24  ;;  %1128 = vmatprep.subr.bf16.mxu1 %v1095_v15 }
  0x47   :  { %1110 = vmatpush3.bf16.msra.mxu0 %v1107_v24 }
  0x4a   :  { %1000 = vmatmul.mubr.f32.vlgmr.msra.gmra.mrb[0].mxu0 %v1340_v25 }
  0x4b   :  { %1002 = vmatprep.mubr.f32.mxu0 %v1342_v26  ;;  %1130 = vmatpush3.bf16.xpose.msra.mxu1 %v1095_v15 }
  0x4c   :  { %1132 = vmatprep.subr.bf16.mxu1 %v1099_v18 }
  0x4e   :  { %1003 = vmatmul.mubr.f32.gmra.mrb[2].mxu0 %v1346_v27 }
  0x4f   :  { %1005 = vmatprep.mubr.f32.mxu0 %v1348_v28 }
  0x52   :  { %1006 = vmatmul.mubr.f32.gmra.mrb[4].mxu0 %v1352_v29 }
  0x53   :  { %1008 = vmatprep.mubr.f32.mxu0 %v1354_v30  ;;  %1134 = vmatpush3.bf16.xpose.msra.mxu1 %v1099_v18 }
  0x54   :  { %1136 = vmatprep.subr.bf16.mxu1 %v1103_v21 }
  0x56   :  { %1009 = vmatmul.mubr.f32.gmra.mrb[6].mxu0 %v1358_v31 }
  0x57   :  { %1011 = vmatprep.mubr.f32.mxu0 %v1360_v32 }
  0x5a   :  { %1012 = vmatmul.mubr.f32.gmra.mrb[8].mxu0 %v1364_v33 }
  0x5b   :  { %1014 = vmatprep.mubr.f32.mxu0 %v1366_v34  ;;  %1138 = vmatpush3.bf16.xpose.msra.mxu1 %v1103_v21 }
  0x5c   :  { %1140 = vmatprep.subr.bf16.mxu1 %v1107_v24 }
  0x5e   :  { %1015 = vmatmul.mubr.f32.gmra.mrb[10].mxu0 %v1370_v35 }
  0x5f   :  { %1017 = vmatprep.mubr.f32.mxu0 %v1372_v36 }
  0x62   :  { %1018 = vmatmul.mubr.f32.gmra.mrb[12].mxu0 %v1376_v37 }
  0x63   :  { %1020 = vmatprep.mubr.f32.mxu0 %v1378_v38  ;;  %1142 = vmatpush3.bf16.xpose.msra.mxu1 %v1107_v24 }
  0x66   :  { %1021 = vmatmul.mubr.f32.gmra.mrb[14].mxu0 %v1382_v39 }
 0x11d   :  { %v1001_v40 = vpop.f32.mrb[0].mxu0 }
 0x11e   :  { %v146_v41 = vpop.f32.mrb[1].mxu0  ;;  %v226_v44 = vmul.f32 2.0, %v1001_v40  ;;  %v295_v40 = vmul.f32 %v1337_v9, %v1337_v9  ;;  %v299_v9 = vmul.f32 %v1348_v28, %v1348_v28  ;;  %v303_v28 = vmul.f32 %v1360_v32, %v1360_v32 }
 0x11f   :  { %v225_v43 = vmul.f32 2.0, %v146_v41  ;;  %v307_v32 = vmul.f32 %v1372_v36, %v1372_v36 }
 0x120   :  { %v248_v51 = vsub.f32 %v870_v42, %v226_v44  ;;  %v297_v44 = vmul.f32 %v1342_v26, %v1342_v26  ;;  %v301_v26 = vmul.f32 %v1354_v30, %v1354_v30  ;;  %v305_v30 = vmul.f32 %v1366_v34, %v1366_v34 }
 0x121   :  { %v1004_v45 = vpop.f32.mrb[2].mxu0  ;;  %v247_v46 = vsub.f32 %v870_v42, %v225_v43  ;;  %v296_v43 = vmul.f32 %v1340_v25, %v1340_v25  ;;  %v300_v25 = vmul.f32 %v1352_v29, %v1352_v29  ;;  %v304_v29 = vmul.f32 %v1364_v33, %v1364_v33 }
 0x122   :  { %v156_v47 = vpop.f32.mrb[3].mxu0  ;;  %v228_v49 = vmul.f32 2.0, %v1004_v45  ;;  %v298_v45 = vmul.f32 %v1346_v27, %v1346_v27  ;;  %v302_v27 = vmul.f32 %v1358_v31, %v1358_v31  ;;  %v306_v31 = vmul.f32 %v1370_v35, %v1370_v35 }
 0x123   :  { %v227_v48 = vmul.f32 2.0, %v156_v47  ;;  %263 = vmin.index.xlane.f32.xlu0 %v247_v46  ;;  %v308_v33 = vmul.f32 %v1376_v37, %v1376_v37  ;;  %v309_v34 = vmul.f32 %v1378_v38, %v1378_v38  ;;  %v310_v35 = vmul.f32 %v1382_v39, %v1382_v39 }
 0x124   :  { %v250_v57 = vsub.f32 %v870_v42, %v228_v49 }
 0x125   :  { %v1007_v50 = vpop.f32.mrb[4].mxu0  ;;  %v249_v52 = vsub.f32 %v870_v42, %v227_v48 }
 0x126   :  { %v166_v53 = vpop.f32.mrb[5].mxu0  ;;  %v230_v55 = vmul.f32 2.0, %v1007_v50  ;;  %v1273_v50 = vmov 1.0  }
 0x127   :  { %v229_v54 = vmul.f32 2.0, %v166_v53  ;;  %265 = vmin.index.xlane.f32.xlu0 %v248_v51  ;;  %267 = vmin.index.xlane.f32.xlu1 %v249_v52 }
 0x128   :  { %v252_v63 = vsub.f32 %v870_v42, %v230_v55 }
 0x129   :  { %v1010_v56 = vpop.f32.mrb[6].mxu0  ;;  %v251_v58 = vsub.f32 %v870_v42, %v229_v54 }
 0x12a   :  { %v176_v59 = vpop.f32.mrb[7].mxu0  ;;  %v232_v61 = vmul.f32 2.0, %v1010_v56 }
 0x12b   :  { %v231_v60 = vmul.f32 2.0, %v176_v59  ;;  %269 = vmin.index.xlane.f32.xlu1 %v250_v57  ;;  %271 = vmin.index.xlane.f32.xlu0 %v251_v58 }
 0x12c   :  { %v254_v5 = vsub.f32 %v870_v42, %v232_v61 }
 0x12d   :  { %v1013_v62 = vpop.f32.mrb[8].mxu0  ;;  %v253_v0 = vsub.f32 %v870_v42, %v231_v60 }
 0x12e   :  { %v186_v1 = vpop.f32.mrb[9].mxu0  ;;  %v234_v3 = vmul.f32 2.0, %v1013_v62 }
 0x12f   :  { %v233_v2 = vmul.f32 2.0, %v186_v1  ;;  %273 = vmin.index.xlane.f32.xlu1 %v252_v63  ;;  %275 = vmin.index.xlane.f32.xlu0 %v253_v0 }
 0x130   :  { %v256_v12 = vsub.f32 %v870_v42, %v234_v3 }
 0x131   :  { %v1016_v4 = vpop.f32.mrb[10].mxu0  ;;  %v255_v6 = vsub.f32 %v870_v42, %v233_v2 }
 0x132   :  { %v196_v7 = vpop.f32.mrb[11].mxu0  ;;  %v236_v10 = vmul.f32 2.0, %v1016_v4 }
 0x133   :  { %v235_v8 = vmul.f32 2.0, %v196_v7  ;;  %277 = vmin.index.xlane.f32.xlu1 %v254_v5  ;;  %279 = vmin.index.xlane.f32.xlu0 %v255_v6 }
 0x134   :  { %v258_v18 = vsub.f32 %v870_v42, %v236_v10 }
 0x135   :  { %v1019_v11 = vpop.f32.mrb[12].mxu0  ;;  %v257_v13 = vsub.f32 %v870_v42, %v235_v8 }
 0x136   :  { %v206_v14 = vpop.f32.mrb[13].mxu0  ;;  %v238_v16 = vmul.f32 2.0, %v1019_v11 }
 0x137   :  { %v237_v15 = vmul.f32 2.0, %v206_v14  ;;  %281 = vmin.index.xlane.f32.xlu1 %v256_v12  ;;  %283 = vmin.index.xlane.f32.xlu0 %v257_v13 }
 0x138   :  { %v260_v23 = vsub.f32 %v870_v42, %v238_v16 }
 0x139   :  { %v1022_v17 = vpop.f32.mrb[14].mxu0  ;;  %v259_v19 = vsub.f32 %v870_v42, %v237_v15 }
 0x13a   :  { %v216_v20 = vpop.f32.mrb[15].mxu0  ;;  %v240_v22 = vmul.f32 2.0, %v1022_v17 }
 0x13b   :  { %v239_v21 = vmul.f32 2.0, %v216_v20  ;;  %285 = vmin.index.xlane.f32.xlu1 %v258_v18  ;;  %287 = vmin.index.xlane.f32.xlu0 %v259_v19 }
 0x13c   :  { %v262_v41 = vsub.f32 %v870_v42, %v240_v22 }
 0x13d   :  { %v261_v24 = vsub.f32 %v870_v42, %v239_v21  ;;  %v407_v42 = vlaneseq }
 0x13f   :  { %289 = vmin.index.xlane.f32.xlu1 %v260_v23  ;;  %291 = vmin.index.xlane.f32.xlu0 %v261_v24  ;;  %v1420_v36 = vand.u32 127, %v407_v42 }
 0x141   :  { %v638_v37 = vadd.s32 4294967288, %v1420_v36  ;;  %v645_v47 = vadd.s32 4294967280, %v1420_v36  ;;  %v652_v38 = vadd.s32 4294967272, %v1420_v36  ;;  %v666_v56 = vadd.s32 4294967256, %v1420_v36 }
 0x142   :  { %v673_v61 = vadd.s32 4294967248, %v1420_v36  ;;  %v680_v3 = vadd.s32 4294967240, %v1420_v36  ;;  %v687_v7 = vadd.s32 4294967232, %v1420_v36 }
 0x143   :  { %293 = vmin.index.xlane.f32.xlu1 %v262_v41  ;;  %311 = vadd.xlane.f32.xlu0 %v295_v40 }
 0x147   :  { %313 = vadd.xlane.f32.xlu1 %v296_v43  ;;  %343 = vmin.xlane.f32.xlu0 %v247_v46  ;;  %v1422_v46 = vshrl.u32 %v407_v42, 7 }
 0x149   :  { %v1429_v49 = vsub.s32 %v1420_v36, %v1422_v46  ;;  %v1433_v39 = vsub.s32 %v638_v37, %v1422_v46  ;;  %v1441_v55 = vsub.s32 %v652_v38, %v1422_v46  ;;  %v1457_v1 = vsub.s32 %v666_v56, %v1422_v46 }
 0x14a   :  { %v1477_v14 = vsub.s32 %v680_v3, %v1422_v46  ;;  %v1483_v17 = vsub.s32 %v687_v7, %v1422_v46 }
 0x14b   :  { %345 = vmin.xlane.f32.xlu1 %v248_v51  ;;  %315 = vadd.xlane.f32.xlu0 %v297_v44  ;;  %v1437_v51 = vsub.s32 %v645_v47, %v1422_v46  ;;  %v715_v44 = vadd.s32 4294967200, %v1420_v36  ;;  %v736_v47 = vadd.s32 4294967176, %v1420_v36 }
 0x14f   :  { %347 = vmin.xlane.f32.xlu1 %v249_v52  ;;  %317 = vadd.xlane.f32.xlu0 %v298_v45  ;;  %v659_v52 = vadd.s32 4294967264, %v1420_v36 }
 0x151   :  { %v1451_v60 = vsub.s32 %v659_v52, %v1422_v46 }
 0x153   :  { %349 = vmin.xlane.f32.xlu1 %v250_v57  ;;  %319 = vadd.xlane.f32.xlu0 %v299_v9 }
 0x157   :  { %351 = vmin.xlane.f32.xlu1 %v251_v58  ;;  %321 = vadd.xlane.f32.xlu0 %v300_v25 }
 0x15b   :  { %353 = vmin.xlane.f32.xlu1 %v252_v63  ;;  %323 = vadd.xlane.f32.xlu0 %v301_v26  ;;  %v722_v26 = vadd.s32 4294967192, %v1420_v36 }
 0x15d   :  { %v1521_v42 = vsub.s32 %v722_v26, %v1422_v46 }
 0x15f   :  { %355 = vmin.xlane.f32.xlu1 %v253_v0  ;;  %325 = vadd.xlane.f32.xlu0 %v302_v27 }
 0x163   :  { %357 = vmin.xlane.f32.xlu1 %v254_v5  ;;  %327 = vadd.xlane.f32.xlu0 %v303_v28 }
 0x167   :  { %359 = vmin.xlane.f32.xlu1 %v255_v6  ;;  %329 = vadd.xlane.f32.xlu0 %v304_v29  ;;  %v1467_v6 = vsub.s32 %v673_v61, %v1422_v46 }
 0x16b   :  { %361 = vmin.xlane.f32.xlu1 %v256_v12  ;;  %331 = vadd.xlane.f32.xlu0 %v305_v30  ;;  %v694_v12 = vadd.s32 4294967224, %v1420_v36 }
 0x16d   :  { %v1489_v22 = vsub.s32 %v694_v12, %v1422_v46 }
 0x16f   :  { %363 = vmin.xlane.f32.xlu1 %v257_v13  ;;  %333 = vadd.xlane.f32.xlu0 %v306_v31  ;;  %v1515_v31 = vsub.s32 %v715_v44, %v1422_v46 }
 0x173   :  { %365 = vmin.xlane.f32.xlu1 %v258_v18  ;;  %335 = vadd.xlane.f32.xlu0 %v307_v32  ;;  %v701_v18 = vadd.s32 4294967216, %v1420_v36  ;;  %v729_v32 = vadd.s32 4294967184, %v1420_v36 }
 0x175   :  { %v1499_v43 = vsub.s32 %v701_v18, %v1422_v46  ;;  %v1531_v52 = vsub.s32 %v729_v32, %v1422_v46 }
 0x177   :  { %367 = vmin.xlane.f32.xlu1 %v259_v19  ;;  %337 = vadd.xlane.f32.xlu0 %v308_v33 }
 0x17b   :  { %369 = vmin.xlane.f32.xlu1 %v260_v23  ;;  %339 = vadd.xlane.f32.xlu0 %v309_v34 }
 0x17f   :  { %371 = vmin.xlane.f32.xlu1 %v261_v24  ;;  %341 = vadd.xlane.f32.xlu0 %v310_v35  ;;  %v708_v24 = vadd.s32 4294967208, %v1420_v36 }
 0x181   :  { %v1509_v28 = vsub.s32 %v708_v24, %v1422_v46 }
 0x183   :  { %373 = vmin.xlane.f32.xlu1 %v262_v41 }
 0x1b0   :  { %v264_v48 = vpop.xlane.xlu0 %263 }
 0x1b1   :  { %vm409_vm0 = vcmp.eq.s32.totalorder %v1420_v36, %v264_v48  ;;  %v748_v57 = vrot.slane %v264_v48, %v1429_v49 }
 0x1b2   :  { %1055 = vmatprep.mubr.msk.f32.mxu1 %vm409_vm0, %v1273_v50  ;;  %vm692_vm0 = vcmask 589312  }
 0x1b4   :  { %v266_v53 = vpop.xlane.xlu0 %265  ;;  %v268_v54 = vpop.xlane.xlu1 %267 }
 0x1b5   :  { %vm410_vm2 = vcmp.eq.s32.totalorder %v1420_v36, %v266_v53  ;;  %v752_v58 = vrot.slane %v266_v53, %v1433_v39  ;;  %vm411_vm3 = vcmp.eq.s32.totalorder %v1420_v36, %v268_v54  ;;  %v757_v59 = vrot.slane %v268_v54, %v1437_v51 }
 0x1b6   :  { %1056 = vmatmul.mubr.msk.f32.vlgmr.msra.gmra.mrb[0].mxu1 %vm410_vm2, %v1273_v50  ;;  %vm699_vm2 = vcmask 654912  }
 0x1b7   :  { %v753_v62 = vsel %vm643_vm1, %v752_v58, %v748_v57  ;;  %1058 = vmatprep.mubr.msk.f32.mxu1 %vm411_vm3, %v1273_v50  ;;  %v1539_v58 = vsub.s32 %v736_v47, %v1422_v46 }
 0x1b8   :  { %v270_v63 = vpop.xlane.xlu1 %269  ;;  %v272_v0 = vpop.xlane.xlu0 %271  ;;  %v758_v4 = vsel %vm650_vm4, %v757_v59, %v753_v62 }
 0x1b9   :  { %vm412_vm6 = vcmp.eq.s32.totalorder %v1420_v36, %v270_v63  ;;  %v762_v2 = vrot.slane %v270_v63, %v1441_v55  ;;  %vm413_vm7 = vcmp.eq.s32.totalorder %v1420_v36, %v272_v0  ;;  %v767_v5 = vrot.slane %v272_v0, %v1451_v60 }
 0x1ba   :  { %1059 = vmatmul.mubr.msk.f32.gmra.mrb[2].mxu1 %vm412_vm6, %v1273_v50 }
 0x1bb   :  { %v763_v8 = vsel %vm657_vm5, %v762_v2, %v758_v4  ;;  %1061 = vmatprep.mubr.msk.f32.mxu1 %vm413_vm7, %v1273_v50  ;;  %vm1627_vm7 = vcmask 720512  }
 0x1bc   :  { %v274_v10 = vpop.xlane.xlu1 %273  ;;  %v276_v11 = vpop.xlane.xlu0 %275  ;;  %v768_v15 = vsel %vm664_vm8, %v767_v5, %v763_v8 }
 0x1bd   :  { %vm414_vm10 = vcmp.eq.s32.totalorder %v1420_v36, %v274_v10  ;;  %v772_v13 = vrot.slane %v274_v10, %v1457_v1  ;;  %vm415_vm11 = vcmp.eq.s32.totalorder %v1420_v36, %v276_v11  ;;  %v777_v16 = vrot.slane %v276_v11, %v1467_v6 }
 0x1be   :  { %1062 = vmatmul.mubr.msk.f32.gmra.mrb[4].mxu1 %vm414_vm10, %v1273_v50  ;;  %vm1628_vm10 = vcmask 786112  }
 0x1bf   :  { %v773_v19 = vsel %vm671_vm9, %v772_v13, %v768_v15  ;;  %1064 = vmatprep.mubr.msk.f32.mxu1 %vm415_vm11, %v1273_v50 }
 0x1c0   :  { %v278_v20 = vpop.xlane.xlu1 %277  ;;  %v280_v21 = vpop.xlane.xlu0 %279  ;;  %v778_v40 = vsel %vm678_vm12, %v777_v16, %v773_v19 }
 0x1c1   :  { %vm416_vm14 = vcmp.eq.s32.totalorder %v1420_v36, %v278_v20  ;;  %v782_v23 = vrot.slane %v278_v20, %v1477_v14  ;;  %vm417_vm15 = vcmp.eq.s32.totalorder %v1420_v36, %v280_v21  ;;  %v787_v41 = vrot.slane %v280_v21, %v1483_v17 }
 0x1c2   :  { %1065 = vmatmul.mubr.msk.f32.gmra.mrb[6].mxu1 %vm416_vm14, %v1273_v50 }
 0x1c3   :  { %v783_v45 = vsel %vm685_vm13, %v782_v23, %v778_v40  ;;  %1067 = vmatprep.mubr.msk.f32.mxu1 %vm417_vm15, %v1273_v50  ;;  %vm720_vm15 = vcmask 851712  }
 0x1c4   :  { %v282_v9 = vpop.xlane.xlu1 %281  ;;  %v284_v25 = vpop.xlane.xlu0 %283  ;;  %v788_v29 = vsel %vm692_vm0, %v787_v41, %v783_v45 }
 0x1c5   :  { %vm418_vm3 = vcmp.eq.s32.totalorder %v1420_v36, %v282_v9  ;;  %v792_v27 = vrot.slane %v282_v9, %v1489_v22  ;;  %vm419_vm6 = vcmp.eq.s32.totalorder %v1420_v36, %v284_v25  ;;  %v797_v30 = vrot.slane %v284_v25, %v1499_v43 }
 0x1c6   :  { %1068 = vmatmul.mubr.msk.f32.gmra.mrb[8].mxu1 %vm418_vm3, %v1273_v50  ;;  %vm727_vm3 = vcmask 917312  }
 0x1c7   :  { %v793_v33 = vsel %vm699_vm2, %v792_v27, %v788_v29  ;;  %1070 = vmatprep.mubr.msk.f32.mxu1 %vm419_vm6, %v1273_v50 }
 0x1c8   :  { %v286_v34 = vpop.xlane.xlu1 %285  ;;  %v288_v35 = vpop.xlane.xlu0 %287  ;;  %v798_v48 = vsel %vm1627_vm7, %v797_v30, %v793_v33 }
 0x1c9   :  { %vm420_vm11 = vcmp.eq.s32.totalorder %v1420_v36, %v286_v34  ;;  %v802_v37 = vrot.slane %v286_v34, %v1509_v28  ;;  %vm421_vm14 = vcmp.eq.s32.totalorder %v1420_v36, %v288_v35  ;;  %v807_v38 = vrot.slane %v288_v35, %v1515_v31 }
 0x1ca   :  { %1071 = vmatmul.mubr.msk.f32.gmra.mrb[10].mxu1 %vm420_vm11, %v1273_v50  ;;  %vm734_vm11 = vcmask 982912  }
 0x1cb   :  { %v803_v53 = vsel %vm1628_vm10, %v802_v37, %v798_v48  ;;  %1073 = vmatprep.mubr.msk.f32.mxu1 %vm421_vm14, %v1273_v50  ;;  %vm741_vm14 = vcmask 1048512  }
 0x1cc   :  { %v290_v54 = vpop.xlane.xlu1 %289  ;;  %v292_v56 = vpop.xlane.xlu0 %291  ;;  %v808_v59 = vsel %vm720_vm15, %v807_v38, %v803_v53 }
 0x1cd   :  { %vm422_vm6 = vcmp.eq.s32.totalorder %v1420_v36, %v290_v54  ;;  %v812_v57 = vrot.slane %v290_v54, %v1521_v42  ;;  %vm423_vm7 = vcmp.eq.s32.totalorder %v1420_v36, %v292_v56  ;;  %v817_v61 = vrot.slane %v292_v56, %v1531_v52 }
 0x1ce   :  { %1074 = vmatmul.mubr.msk.f32.gmra.mrb[12].mxu1 %vm422_vm6, %v1273_v50 }
 0x1cf   :  { %v813_v62 = vsel %vm727_vm3, %v812_v57, %v808_v59  ;;  %1076 = vmatprep.mubr.msk.f32.mxu1 %vm423_vm7, %v1273_v50 }
 0x1d0   :  { %v294_v63 = vpop.xlane.xlu1 %293  ;;  %v312_v0 = vpop.xlane.xlu0 %311  ;;  %v818_v46 = vsel %vm734_vm11, %v817_v61, %v813_v62 }
 0x1d1   :  { %vm424_vm10 = vcmp.eq.s32.totalorder %v1420_v36, %v294_v63  ;;  %v822_v2 = vrot.slane %v294_v63, %v1539_v58 }
 0x1d2   :  { %1077 = vmatmul.mubr.msk.f32.gmra.mrb[14].mxu1 %vm424_vm10, %v1273_v50 }
 0x1d3   :  { %v823_v3 = vsel %vm741_vm14, %v822_v2, %v818_v46 }
 0x1d4   :  { %v314_v4 = vpop.xlane.xlu1 %313  ;;  %v344_v5 = vpop.xlane.xlu0 %343  ;;  %824 = vst [vmem:[#allocation10] sm:$0x1] %v823_v3 }
 0x1d5   :  { %v375_v7 = vadd.f32 %v344_v5, %v312_v0 }
 0x1d7   :  { %v391_v11 = vmax.f32 %v375_v7, 0.0 }
 0x1d8   :  { %v346_v8 = vpop.xlane.xlu1 %345  ;;  %v316_v10 = vpop.xlane.xlu0 %315 }
 0x1d9   :  { %v376_v12 = vadd.f32 %v346_v8, %v314_v4  ;;  %v637_v36 = vrot.slane %v391_v11, %v1429_v49 }
 0x1db   :  { %v392_v13 = vmax.f32 %v376_v12, 0.0 }
 0x1dc   :  { %v348_v15 = vpop.xlane.xlu1 %347  ;;  %v318_v16 = vpop.xlane.xlu0 %317 }
 0x1dd   :  { %v642_v18 = vrot.slane %v392_v13, %v1433_v39  ;;  %v377_v19 = vadd.f32 %v348_v15, %v316_v10 }
 0x1df   :  { %v644_v50 = vsel %vm643_vm1, %v642_v18, %v637_v36  ;;  %v393_v20 = vmax.f32 %v377_v19, 0.0  ;;  %vm1629_vm1 = vcmask 720512  }
 0x1e0   :  { %v350_v21 = vpop.xlane.xlu1 %349  ;;  %v320_v23 = vpop.xlane.xlu0 %319 }
 0x1e1   :  { %v649_v24 = vrot.slane %v393_v20, %v1437_v51  ;;  %v378_v40 = vadd.f32 %v350_v21, %v318_v16 }
 0x1e3   :  { %v651_v41 = vsel %vm650_vm4, %v649_v24, %v644_v50  ;;  %v394_v44 = vmax.f32 %v378_v40, 0.0  ;;  %vm1630_vm4 = vcmask 786112  }
 0x1e4   :  { %v352_v45 = vpop.xlane.xlu1 %351  ;;  %v322_v9 = vpop.xlane.xlu0 %321 }
 0x1e5   :  { %v656_v25 = vrot.slane %v394_v44, %v1441_v55  ;;  %v379_v26 = vadd.f32 %v352_v45, %v320_v23 }
 0x1e7   :  { %v658_v49 = vsel %vm657_vm5, %v656_v25, %v651_v41  ;;  %v395_v39 = vmax.f32 %v379_v26, 0.0 }
 0x1e8   :  { %v354_v27 = vpop.xlane.xlu1 %353  ;;  %v324_v29 = vpop.xlane.xlu0 %323 }
 0x1e9   :  { %v663_v30 = vrot.slane %v395_v39, %v1451_v60  ;;  %v380_v32 = vadd.f32 %v354_v27, %v322_v9 }
 0x1eb   :  { %v665_v33 = vsel %vm664_vm8, %v663_v30, %v658_v49  ;;  %v396_v51 = vmax.f32 %v380_v32, 0.0 }
 0x1ec   :  { %v356_v34 = vpop.xlane.xlu1 %355  ;;  %v326_v35 = vpop.xlane.xlu0 %325 }
 0x1ed   :  { %v670_v37 = vrot.slane %v396_v51, %v1457_v1  ;;  %v381_v47 = vadd.f32 %v356_v34, %v324_v29 }
 0x1ef   :  { %v672_v48 = vsel %vm671_vm9, %v670_v37, %v665_v33  ;;  %v397_v55 = vmax.f32 %v381_v47, 0.0 }
 0x1f0   :  { %v358_v38 = vpop.xlane.xlu1 %357  ;;  %v328_v53 = vpop.xlane.xlu0 %327 }
 0x1f1   :  { %v677_v54 = vrot.slane %v397_v55, %v1467_v6  ;;  %v382_v56 = vadd.f32 %v358_v38, %v326_v35 }
 0x1f3   :  { %v679_v57 = vsel %vm678_vm12, %v677_v54, %v672_v48  ;;  %v398_v60 = vmax.f32 %v382_v56, 0.0 }
 0x1f4   :  { %v360_v59 = vpop.xlane.xlu1 %359  ;;  %v330_v61 = vpop.xlane.xlu0 %329 }
 0x1f5   :  { %v684_v62 = vrot.slane %v398_v60, %v1477_v14  ;;  %v383_v63 = vadd.f32 %v360_v59, %v328_v53 }
 0x1f7   :  { %v686_v0 = vsel %vm685_vm13, %v684_v62, %v679_v57  ;;  %v399_v1 = vmax.f32 %v383_v63, 0.0 }
 0x1f8   :  { %v362_v2 = vpop.xlane.xlu1 %361  ;;  %v332_v46 = vpop.xlane.xlu0 %331 }
 0x1f9   :  { %v691_v3 = vrot.slane %v399_v1, %v1483_v17  ;;  %v384_v4 = vadd.f32 %v362_v2, %v330_v61 }
 0x1fb   :  { %v693_v5 = vsel %vm692_vm0, %v691_v3, %v686_v0  ;;  %v400_v6 = vmax.f32 %v384_v4, 0.0 }
 0x1fc   :  { %v364_v7 = vpop.xlane.xlu1 %363  ;;  %v334_v8 = vpop.xlane.xlu0 %333 }
 0x1fd   :  { %v698_v10 = vrot.slane %v400_v6, %v1489_v22  ;;  %v385_v11 = vadd.f32 %v364_v7, %v332_v46 }
 0x1ff   :  { %v700_v12 = vsel %vm699_vm2, %v698_v10, %v693_v5  ;;  %v401_v14 = vmax.f32 %v385_v11, 0.0 }
 0x200   :  { %v366_v13 = vpop.xlane.xlu1 %365  ;;  %v336_v15 = vpop.xlane.xlu0 %335 }
 0x201   :  { %v705_v16 = vrot.slane %v401_v14, %v1499_v43  ;;  %v386_v36 = vadd.f32 %v366_v13, %v334_v8 }
 0x203   :  { %v707_v18 = vsel %vm1629_vm1, %v705_v16, %v700_v12  ;;  %v402_v17 = vmax.f32 %v386_v36, 0.0 }
 0x204   :  { %v368_v19 = vpop.xlane.xlu1 %367  ;;  %v338_v50 = vpop.xlane.xlu0 %337 }
 0x205   :  { %v712_v20 = vrot.slane %v402_v17, %v1509_v28  ;;  %v387_v21 = vadd.f32 %v368_v19, %v336_v15 }
 0x207   :  { %v714_v23 = vsel %vm1630_vm4, %v712_v20, %v707_v18  ;;  %v403_v22 = vmax.f32 %v387_v21, 0.0 }
 0x208   :  { %v370_v24 = vpop.xlane.xlu1 %369  ;;  %v340_v40 = vpop.xlane.xlu0 %339 }
 0x209   :  { %v719_v41 = vrot.slane %v403_v22, %v1515_v31  ;;  %v388_v44 = vadd.f32 %v370_v24, %v338_v50 }
 0x20b   :  { %v721_v45 = vsel %vm720_vm15, %v719_v41, %v714_v23  ;;  %v404_v43 = vmax.f32 %v388_v44, 0.0 }
 0x20c   :  { %v372_v9 = vpop.xlane.xlu1 %371  ;;  %v342_v49 = vpop.xlane.xlu0 %341 }
 0x20d   :  { %v726_v25 = vrot.slane %v404_v43, %v1521_v42  ;;  %v389_v26 = vadd.f32 %v372_v9, %v340_v40 }
 0x20f   :  { %v405_v39 = vmax.f32 %v389_v26, 0.0  ;;  %v728_v28 = vsel %vm727_vm3, %v726_v25, %v721_v45 }
 0x210   :  { %v374_v27 = vpop.xlane.xlu1 %373 }
 0x211   :  { %v390_v29 = vadd.f32 %v374_v27, %v342_v49  ;;  %v733_v30 = vrot.slane %v405_v39, %v1531_v52 }
 0x213   :  { %v406_v32 = vmax.f32 %v390_v29, 0.0  ;;  %v735_v31 = vsel %vm734_vm11, %v733_v30, %v728_v28 }
 0x215   :  { %v740_v33 = vrot.slane %v406_v32, %v1539_v58 }
 0x217   :  { %v742_v51 = vsel %vm741_vm14, %v740_v33, %v735_v31 }
 0x218   :  { %744 = vst [vmem:[#allocation8] sm:$0x1] %v742_v51 }
 0x219   :  { %1206 = shalt.err (!%p1203_p6)
}
 0x21a   :  { %s1207_s24 = scalar_lea.hbm %s1625_s4, 16 }
 0x21b   :  { %p1208_p7 = scmp.ne.s32.totalorder %s1625_s4, %s1207_s24  ;;  %p1211_p8 = scmp.lt.u32.totalorder %s1207_s24, %s1625_s4 }
 0x21d   :  { %p1213_p9 = pnand %p1211_p8, %p1208_p7 }
 0x21f   :  { %1216 = shalt.err (!%p1213_p9)
}
 0x220   :  { %846 = dma.vmem_to_hbm [thread:$0]  %s844_s19, 16, %s1625_s4, [#allocation9]  }
 0x221   :  { %s1275_s8 = smov [#allocation10]  }
 0x222   :  { %s853_s9 = sshll.u32 %s1275_s8, 4  ;;  %s854_s9 = int_to_ptr.vmem [resolvable:$true] %s853_s9 }
 0x223   :  { %s1217_s10 = scalar_lea.vmem %s854_s9, 16  ;;  %s1221_s11 = scalar_lea.vmem %s854_s9, 32 }
 0x224   :  { %p1218_p10 = scmp.ne.s32.totalorder %s854_s9, %s1217_s10  ;;  %p1222_p11 = scmp.lt.s32.totalorder %s854_s9, %s854_s9 }
 0x225   :  { %p1223_p12 = scmp.lt.s32.totalorder %s1221_s11, %s1217_s10 }
 0x227   :  { %p1224_p13 = por %p1223_p12, %p1222_p11 }
 0x229   :  { %p1225_p0 = pnand %p1224_p13, %p1218_p10 }
 0x22b   :  { %1228 = shalt.err (!%p1225_p0)
}
 0x22c   :  { %s1229_s14 = scalar_lea.hbm %s1626_s5, 16 }
 0x22d   :  { %p1230_p1 = scmp.ne.s32.totalorder %s1626_s5, %s1229_s14  ;;  %p1233_p2 = scmp.lt.u32.totalorder %s1229_s14, %s1626_s5 }
 0x22f   :  { %p1235_p3 = pnand %p1233_p2, %p1230_p1 }
 0x231   :  { %1238 = shalt.err (!%p1235_p3)
}
 0x232   :  { %856 = dma.vmem_to_hbm [thread:$0]  %s854_s9, 16, %s1626_s5, [#allocation9]  }
 0x233   :  { %s1276_s5 = smov [#allocation7]  }
 0x234   :  { %s830_s18 = sshll.u32 %s1276_s5, 4  ;;  %s831_s18 = int_to_ptr.vmem [resolvable:$true] %s830_s18 }
 0x235   :  { %s1239_s2 = scalar_lea.vmem %s831_s18, 2048  ;;  %p1244_p5 = scmp.lt.s32.totalorder %s831_s18, %s831_s18 }
 0x236   :  { %p1240_p4 = scmp.ne.s32.totalorder %s831_s18, %s1239_s2  ;;  %p1245_p6 = scmp.lt.s32.totalorder %s1239_s2, %s1239_s2 }
 0x238   :  { %p1246_p7 = por %p1245_p6, %p1244_p5 }
 0x23a   :  { %p1247_p8 = pnand %p1246_p7, %p1240_p4 }
 0x289   :  { %v1057_v42 = vpop.f32.mrb[0].mxu1 }
 0x28a   :  { %603 = vst [vmem:[#allocation7 + $0x8] sm:$0xff] %v1057_v42  ;;  %v523_v52 = vpop.f32.mrb[1].mxu1 }
 0x28b   :  { %602 = vst [vmem:[#allocation7] sm:$0xff] %v523_v52 }
 0x28d   :  { %v1060_v58 = vpop.f32.mrb[2].mxu1 }
 0x28e   :  { %605 = vst [vmem:[#allocation7 + $0x18] sm:$0xff] %v1060_v58  ;;  %v533_v34 = vpop.f32.mrb[3].mxu1 }
 0x28f   :  { %604 = vst [vmem:[#allocation7 + $0x10] sm:$0xff] %v533_v34 }
 0x291   :  { %v1063_v35 = vpop.f32.mrb[4].mxu1 }
 0x292   :  { %607 = vst [vmem:[#allocation7 + $0x28] sm:$0xff] %v1063_v35  ;;  %v543_v37 = vpop.f32.mrb[5].mxu1 }
 0x293   :  { %606 = vst [vmem:[#allocation7 + $0x20] sm:$0xff] %v543_v37 }
 0x295   :  { %v1066_v47 = vpop.f32.mrb[6].mxu1 }
 0x296   :  { %609 = vst [vmem:[#allocation7 + $0x38] sm:$0xff] %v1066_v47  ;;  %v553_v48 = vpop.f32.mrb[7].mxu1 }
 0x297   :  { %608 = vst [vmem:[#allocation7 + $0x30] sm:$0xff] %v553_v48 }
 0x299   :  { %v1069_v55 = vpop.f32.mrb[8].mxu1 }
 0x29a   :  { %611 = vst [vmem:[#allocation7 + $0x48] sm:$0xff] %v1069_v55  ;;  %v563_v38 = vpop.f32.mrb[9].mxu1 }
 0x29b   :  { %610 = vst [vmem:[#allocation7 + $0x40] sm:$0xff] %v563_v38 }
 0x29d   :  { %v1072_v53 = vpop.f32.mrb[10].mxu1 }
 0x29e   :  { %613 = vst [vmem:[#allocation7 + $0x58] sm:$0xff] %v1072_v53  ;;  %v573_v54 = vpop.f32.mrb[11].mxu1 }
 0x29f   :  { %612 = vst [vmem:[#allocation7 + $0x50] sm:$0xff] %v573_v54 }
 0x2a1   :  { %v1075_v56 = vpop.f32.mrb[12].mxu1 }
 0x2a2   :  { %615 = vst [vmem:[#allocation7 + $0x68] sm:$0xff] %v1075_v56  ;;  %v583_v57 = vpop.f32.mrb[13].mxu1 }
 0x2a3   :  { %614 = vst [vmem:[#allocation7 + $0x60] sm:$0xff] %v583_v57 }
 0x2a5   :  { %v1078_v60 = vpop.f32.mrb[14].mxu1 }
 0x2a6   :  { %617 = vst [vmem:[#allocation7 + $0x78] sm:$0xff] %v1078_v60  ;;  %v593_v59 = vpop.f32.mrb[15].mxu1 }
 0x2a7   :  { %616 = vst [vmem:[#allocation7 + $0x70] sm:$0xff] %v593_v59 }
 0x2a8   :  { %1250 = shalt.err (!%p1247_p8)
}
 0x2a9   :  { %s1251_s21 = scalar_lea.hbm %s1624_s3, 2048 }
 0x2aa   :  { %p1252_p9 = scmp.ne.s32.totalorder %s1624_s3, %s1251_s21  ;;  %p1255_p10 = scmp.lt.u32.totalorder %s1251_s21, %s1624_s3 }
 0x2ac   :  { %p1257_p11 = pnand %p1255_p10, %p1252_p9 }
 0x2ae   :  { %1260 = shalt.err (!%p1257_p11)
}
 0x2af   :  { %836 = dma.vmem_to_hbm [thread:$0]  %s831_s18, 2048, %s1624_s3, [#allocation4], %s1270_s28, %s1270_s28, %s1271_s29  }
 0x2b0   :  { %1265 = dma.done.wait [#allocation4], 2048  }
 0x2b1   :  { %1266 = vsyncadd [#allocation4], 4294965248 }
 0x2b2   :  { %1267 = dma.done.wait [#allocation9], 32  }
 0x2b3   :  { %1268 = vsyncadd [#allocation9], 4294967264 }
 0x2b4   :  { %866 = vsyncpa [#allocation3], 1 }
 0x2b5   :  { %867 = vsyncpa [#allocation6], 1 }
 0x2b6   :  { %868 = vsyncpa [#allocation4], 1 }
 0x2b7   :  { %869 = vsyncpa [#allocation9], 1 }

</bundles_post_ra>
